<compile_context>
chip_gen: v6e
topology: v6e:2x2x1
jax: 0.10.0
libtpu: 0.0.40
codegen_flags: <defaults>
</compile_context>

<pallas_src>
import jax
import jax.numpy as jnp
from jax.experimental import pallas as pl
from jax.experimental.pallas import tpu as pltpu


# ---------------- tiling heuristics (trace time; shapes are static) ----------------
def _pick_lane_width(G, max_lane=8192):
    """Lane width S for viewing a contiguous group of G elements as (G // S, S).
    Prefer the largest divisor of G that is a multiple of 128 (unmasked stores)."""
    if G <= max_lane:
        return G
    best_128, best_any = 0, 1
    i = 1
    while i * i <= G:
        if G % i == 0:
            for d in (i, G // i):
                if d <= max_lane:
                    best_any = max(best_any, d)
                    if d % 128 == 0:
                        best_128 = max(best_128, d)
        i += 1
    return best_128 if best_128 else best_any


def _pick_row_tile(R_g, S, itemsize, target_bytes=2 << 20):
    """Rows per block: ~2 MiB blocks, rounded to the dtype's packed sublane multiple.
    Returns R_g (full extent -- always a legal block) when the whole group fits."""
    sub = max(8, 32 // itemsize)               # f32: 8, bf16: 16, int8/fp8: 32
    tr = max(1, target_bytes // (S * itemsize))
    if tr >= R_g:
        return R_g
    tr = max(sub, (tr // sub) * sub)
    return R_g if tr >= R_g else tr


# ---------------- kernel ----------------
def _make_mask_kernel(tr, n_t, tail):
    def kernel(mask_ref, x_hbm, o_ref, buf, copy_sem):
        g = pl.program_id(0)                   # which (b, k) modality group
        t = pl.program_id(1)                   # which row tile inside the group
        keep = mask_ref[g] != 0                # scalar flag from SMEM

        def dma(nrows):                        # HBM -> VMEM copy of this tile (static size)
            row0 = pl.multiple_of(t * tr, tr)
            cp = pltpu.make_async_copy(
                x_hbm.at[g, pl.ds(row0, nrows), :],
                buf.at[pl.ds(0, nrows), :],
                copy_sem,
            )
            cp.start()
            cp.wait()

        @pl.when(keep)
        def _copy():
            if tail == tr:                     # grid divides evenly: one static DMA size
                dma(tr)
            else:                              # ragged last tile: static tail-sized DMA
                @pl.when(t != n_t - 1)
                def _full():
                    dma(tr)

                @pl.when(t == n_t - 1)
                def _last():
                    dma(tail)

            o_ref[0] = buf[...]                # rows >= tail are never written back (clipped)

        @pl.when(jnp.logical_not(keep))
        def _zero():                           # dropped modality: never read x from HBM
            o_ref[...] = jnp.zeros_like(o_ref)

    return kernel


# ---------------- MaskModal forward ----------------
@jax.jit
def mask_modal_forward(x, mask):
    B, K, C, H, W, Z = x.shape
    itemsize = x.dtype.itemsize
    G = C * H * W * Z                          # one (b, k) modality group, contiguous
    S = _pick_lane_width(G)
    R_g = G // S
    tr = _pick_row_tile(R_g, S, itemsize)
    n_t = (R_g + tr - 1) // tr
    tail = R_g - (n_t - 1) * tr

    x3 = x.reshape(B * K, R_g, S)              # contiguous view, no data movement
    m1 = mask.reshape(B * K).astype(jnp.int32)

    block_bytes = tr * S * itemsize            # out double-buffer + scratch buf + margin
    vmem_limit = int(min(32 << 20, max(16 << 20, 5 * block_bytes + (2 << 20))))

    y3 = pl.pallas_call(
        _make_mask_kernel(tr, n_t, tail),
        out_shape=jax.ShapeDtypeStruct((B * K, R_g, S), x.dtype),
        grid_spec=pltpu.PrefetchScalarGridSpec(
            num_scalar_prefetch=1,
            grid=(B * K, n_t),
            in_specs=[pl.BlockSpec(memory_space=pl.ANY)],           # raw HBM; read only if kept
            out_specs=pl.BlockSpec((1, tr, S), lambda g, t, m: (g, t, 0)),
            scratch_shapes=[
                pltpu.VMEM((tr, S), x.dtype),
                pltpu.SemaphoreType.DMA,
            ],
        ),
        compiler_params=pltpu.CompilerParams(
            dimension_semantics=("parallel", "parallel"),
            vmem_limit_bytes=vmem_limit,
        ),
    )(m1, x3)

    return y3.reshape(B, K * C, H, W, Z)


# ---------------- pure-JAX reference ----------------
def _reference(x, mask):
    B, K, C, H, W, Z = x.shape
    keep = mask[:, :, None, None, None, None]
    y = jnp.where(keep, x, jnp.zeros_like(x))
    return y.reshape(B, K * C, H, W, Z)


if __name__ == "__main__":
    B, K, C, H, W, Z = 2, 4, 16, 16, 16, 16
    key = jax.random.PRNGKey(0)
    x = jax.random.normal(key, (B, K, C, H, W, Z), dtype=jnp.float32)
    # deterministic modality-presence mask (at least one kept and one dropped per batch)
    mask = jnp.array([[True, False, True, True],
                      [False, True, True, False]])
    # a NaN inside a *dropped* modality must still come out as exactly 0 (PyTorch semantics)
    x = x.at[0, 1, 0, 0, 0, 0].set(jnp.nan)

    out = jax.block_until_ready(mask_modal_forward(x, mask))

    ref = _reference(x, mask)
    assert out.shape == (B, K * C, H, W, Z)
    assert out.dtype == x.dtype
    assert bool(jnp.array_equal(out, ref))
    assert float(out[0, 1 * C + 0, 0, 0, 0]) == 0.0   # dropped-modality NaN -> exact zero

    print("KERNEL_OK")
</pallas_src>

<mosaic_0001>
module attributes {stable_mosaic.version = 11 : i64} {
  func.func @kernel(%arg0: i32, %arg1: i32, %arg2: memref<8xi32, #tpu.memory_space<smem>>, %arg3: memref<8x8x8192xf32, #tpu.memory_space<any>>, %arg4: memref<1x8x8192xf32, #tpu.memory_space<vmem>>, %arg5: memref<8x8192xf32, #tpu.memory_space<vmem>>, %arg6: memref<!tpu.dma_semaphore, #tpu.memory_space<semaphore_mem>>) attributes {dimension_semantics = [#tpu.dimension_semantics<parallel>, #tpu.dimension_semantics<parallel>], iteration_bounds = array<i64: 8, 1>, scalar_prefetch = 1 : i64, scratch_operands = 2 : i64, tpu.core_type = #tpu.core_type<tc>, window_params = [{}, {transform_indices = @transform_1, window_bounds = array<i64: 1, 8, 8192>}]} {
    %0 = arith.index_cast %arg0 : i32 to index
    %1 = memref.load %arg2[%0] : memref<8xi32, #tpu.memory_space<smem>>
    %c0_i32 = arith.constant 0 : i32
    %2 = arith.cmpi ne, %1, %c0_i32 : i32
    %3 = arith.extui %2 : i1 to i32
    %c0_i32_0 = arith.constant 0 : i32
    %4 = arith.cmpi ne, %3, %c0_i32_0 : i32
    scf.if %4 {
      %c8_i32 = arith.constant 8 : i32
      %8 = arith.muli %arg1, %c8_i32 : i32
      %9 = tpu.assume_multiple %8, 8 : i32
      %c0_i32_2 = arith.constant 0 : i32
      %10 = tpu.memref_slice %arg3[%arg0, %9, %c0_i32_2] : memref<8x8x8192xf32, #tpu.memory_space<any>> -> memref<1x8x8192xf32, #tpu.memory_space<any>>
      %11 = tpu.memref_squeeze %10 : memref<1x8x8192xf32, #tpu.memory_space<any>> -> memref<8x8192xf32, #tpu.memory_space<any>>
      %c0_i32_3 = arith.constant 0 : i32
      %c0_i32_4 = arith.constant 0 : i32
      %12 = tpu.memref_slice %arg5[%c0_i32_3, %c0_i32_4] : memref<8x8192xf32, #tpu.memory_space<vmem>> -> memref<8x8192xf32, #tpu.memory_space<vmem>>
      tpu.enqueue_dma source(%11 : memref<8x8192xf32, #tpu.memory_space<any>>) target(%12 : memref<8x8192xf32, #tpu.memory_space<vmem>>) target_semaphore(%arg6 : memref<!tpu.dma_semaphore, #tpu.memory_space<semaphore_mem>>)
      %c0_i32_5 = arith.constant 0 : i32
      %13 = tpu.memref_slice %arg3[%arg0, %9, %c0_i32_5] : memref<8x8x8192xf32, #tpu.memory_space<any>> -> memref<1x8x8192xf32, #tpu.memory_space<any>>
      %14 = tpu.memref_squeeze %13 : memref<1x8x8192xf32, #tpu.memory_space<any>> -> memref<8x8192xf32, #tpu.memory_space<any>>
      %c0_i32_6 = arith.constant 0 : i32
      %c0_i32_7 = arith.constant 0 : i32
      %15 = tpu.memref_slice %arg5[%c0_i32_6, %c0_i32_7] : memref<8x8192xf32, #tpu.memory_space<vmem>> -> memref<8x8192xf32, #tpu.memory_space<vmem>>
      tpu.wait_dma2 semaphore(%arg6 : memref<!tpu.dma_semaphore, #tpu.memory_space<semaphore_mem>>) src(%14 : memref<8x8192xf32, #tpu.memory_space<any>>) dst(%15 : memref<8x8192xf32, #tpu.memory_space<vmem>>)
      %c0 = arith.constant 0 : index
      %c0_8 = arith.constant 0 : index
      %16 = vector.load %arg5[%c0, %c0_8] : memref<8x8192xf32, #tpu.memory_space<vmem>>, vector<8x8192xf32>
      %c0_9 = arith.constant 0 : index
      %c0_10 = arith.constant 0 : index
      %c0_11 = arith.constant 0 : index
      %17 = vector.load %arg4[%c0_9, %c0_10, %c0_11] : memref<1x8x8192xf32, #tpu.memory_space<vmem>>, vector<1x8x8192xf32>
      %18 = vector.shape_cast %17 : vector<1x8x8192xf32> to vector<8x8192xf32>
      %19 = vector.shape_cast %16 : vector<8x8192xf32> to vector<1x8x8192xf32>
      tpu.vector_store %arg4[%c0_9, %c0_10, %c0_11], %19 {strides = array<i32>} : memref<1x8x8192xf32, #tpu.memory_space<vmem>>, vector<1x8x8192xf32>,
    } else {
    }
    %true = arith.constant true
    %5 = arith.xori %2, %true : i1
    %6 = arith.extui %5 : i1 to i32
    %c0_i32_1 = arith.constant 0 : i32
    %7 = arith.cmpi ne, %6, %c0_i32_1 : i32
    scf.if %7 {
      %cst = arith.constant 0.000000e+00 : f32
      %8 = vector.broadcast %cst : f32 to vector<1x8x8192xf32>
      %c0 = arith.constant 0 : index
      %c0_2 = arith.constant 0 : index
      %c0_3 = arith.constant 0 : index
      %9 = vector.load %arg4[%c0, %c0_2, %c0_3] : memref<1x8x8192xf32, #tpu.memory_space<vmem>>, vector<1x8x8192xf32>
      tpu.vector_store %arg4[%c0, %c0_2, %c0_3], %8 {strides = array<i32>} : memref<1x8x8192xf32, #tpu.memory_space<vmem>>, vector<1x8x8192xf32>,
    } else {
    }
    return
  }
  func.func @transform_1(%arg0: i32, %arg1: i32, %arg2: memref<8xi32, #tpu.memory_space<smem>>) -> (i32, i32, i32) {
    %c0_i32 = arith.constant 0 : i32
    %c0_i32_0 = arith.constant 0 : i32
    return %arg0, %arg1, %c0_i32 : i32, i32, i32
  }
}

</mosaic_0001>

<bundles_post_ra>
// kernel: mask_modal_forward.1
= control target key start
LH: loop header
LB: loop body
LE: loop exit
PB: predicated region body
PF: predicated region fallthrough
CT: control target
= control target key end

     0   :  { %s1102_s0 = inlined_call_operand.vmem [shape: s32[8], index: 0, kind: input, shape index: {}]   ;;  %s1103_s1 = inlined_call_operand.vmem [shape: f32[8,8,8192], index: 1, kind: input, shape index: {}]   ;;  %s1104_s2 = inlined_call_operand.vmem [shape: f32[8,8,8192], index: 2, kind: output, shape index: {}]  }
   0x1   :  { %s7_s11 = sshll.u32 %s1102_s0, 4  ;;  %s8_s11 = int_to_ptr.vmem [resolvable:$true] %s7_s11 }
   0x2   :  { %s571_s12 = scalar_lea.vmem %s8_s11, 16  ;;  %p576_p1 = scmp.lt.s32.totalorder %s8_s11, %s8_s11 }
   0x3   :  { %p572_p0 = scmp.ne.s32.totalorder %s8_s11, %s571_s12  ;;  %p577_p2 = scmp.lt.s32.totalorder %s571_s12, %s571_s12 }
   0x5   :  { %p578_p3 = por %p577_p2, %p576_p1 }
   0x7   :  { %p579_p4 = pnand %p578_p3, %p572_p0 }
   0x9   :  { %582 = shalt.err (!%p579_p4)  }
   0xa   :  { %s603_s13 = smov [#allocation5]  }
   0xb   :  { %10 = dma.vmem_to_smem %s8_s11, 16, %s603_s13, [#allocation4] }
   0xc   :  { %591 = dma.done.wait [#allocation4], 16 }
   0xd   :  { %592 = vsyncadd [#allocation4], 4294967280 }
   0xe   :  { %12 = sfence }
   0xf   :  { %s623_s14 = smov 0   ;;  %s625_s15 = smov 0  }
  0x10 LB: > { %s27_s0 = sadd.s32 1, %s597_s14  ;;  %p541_p6 = scmp.ge.s32.totalorder %s601_s15, 8  ;;  %s601_s15 = sphi %s625_s15, %s18_s15   ;;  %s597_s14 = sphi %s623_s14, %s1105_s14  }
  0x11   : > { %p29_p5 = scmp.ge.s32.totalorder %s27_s0, 8  ;;  %p67_p7 = scmp.lt.s32.totalorder (!%p541_p6), %s597_s14, 7 }
  0x12   : > { %55 = sbr.rel (%p541_p6) target bundleno = 128 (0x80), region = 12  ;;  %s634_s16 = sld [smem:[#allocation5 + %s597_s14]] (!%p541_p6) }
  0x13   : > { %s1107_s0 = smov (%p29_p5, %s27_s0), 0 }
  0x17   : > { %s68_s17 = scalar_select %p67_p7, %s597_s14, 7 }
  0x18   : > { %p544_p8 = scmp.eq.s32.totalorder %s634_s16, 0 }
  0x19   : > { %s551_s18 = sshll.u32 %s68_s17, 9  ;;  %s552_s22 = sshll.u32 (!%p544_p8), %s597_s14, 9 }
  0x1a   : > { %s639_s21 = scalar_lea.vmem %s1104_s2, %s551_s18  ;;  %80 = sbr.rel (%p544_p8) target bundleno = 88 (0x58), region = 16 }
  0x1b   : > { %s645_s25 = scalar_lea.vmem (!%p544_p8), %s1103_s1, %s552_s22 }
  0x1f   : > { %v648_v0 = vld [vmem:[%s645_s25] sm:$0xff]  ;;  %v651_v1 = vld [vmem:[%s645_s25 + $0x8] sm:$0xff]  ;;  %v654_v2 = vld [vmem:[%s645_s25 + $0x10] sm:$0xff] }
  0x20   : > { %v657_v3 = vld [vmem:[%s645_s25 + $0x18] sm:$0xff]  ;;  %v660_v4 = vld [vmem:[%s645_s25 + $0x20] sm:$0xff]  ;;  %v663_v5 = vld [vmem:[%s645_s25 + $0x28] sm:$0xff] }
  0x21   : > { %v666_v6 = vld [vmem:[%s645_s25 + $0x30] sm:$0xff]  ;;  %v669_v7 = vld [vmem:[%s645_s25 + $0x38] sm:$0xff]  ;;  %v672_v8 = vld [vmem:[%s645_s25 + $0x40] sm:$0xff] }
  0x22   : > { %v675_v9 = vld [vmem:[%s645_s25 + $0x48] sm:$0xff]  ;;  %v678_v10 = vld [vmem:[%s645_s25 + $0x50] sm:$0xff]  ;;  %v681_v11 = vld [vmem:[%s645_s25 + $0x58] sm:$0xff] }
  0x23   : > { %v684_v12 = vld [vmem:[%s645_s25 + $0x60] sm:$0xff]  ;;  %v687_v13 = vld [vmem:[%s645_s25 + $0x68] sm:$0xff]  ;;  %v690_v14 = vld [vmem:[%s645_s25 + $0x70] sm:$0xff] }
  0x24   : > { %v693_v15 = vld [vmem:[%s645_s25 + $0x78] sm:$0xff]  ;;  %v696_v16 = vld [vmem:[%s645_s25 + $0x80] sm:$0xff]  ;;  %v699_v17 = vld [vmem:[%s645_s25 + $0x88] sm:$0xff] }
  0x25   : > { %v702_v18 = vld [vmem:[%s645_s25 + $0x90] sm:$0xff]  ;;  %v705_v19 = vld [vmem:[%s645_s25 + $0x98] sm:$0xff]  ;;  %v708_v20 = vld [vmem:[%s645_s25 + $0xa0] sm:$0xff] }
  0x26   : > { %v711_v21 = vld [vmem:[%s645_s25 + $0xa8] sm:$0xff]  ;;  %v714_v22 = vld [vmem:[%s645_s25 + $0xb0] sm:$0xff]  ;;  %v717_v23 = vld [vmem:[%s645_s25 + $0xb8] sm:$0xff] }
  0x27   : > { %v720_v24 = vld [vmem:[%s645_s25 + $0xc0] sm:$0xff]  ;;  %v723_v25 = vld [vmem:[%s645_s25 + $0xc8] sm:$0xff]  ;;  %v726_v26 = vld [vmem:[%s645_s25 + $0xd0] sm:$0xff] }
  0x28   : > { %v729_v27 = vld [vmem:[%s645_s25 + $0xd8] sm:$0xff]  ;;  %v732_v28 = vld [vmem:[%s645_s25 + $0xe0] sm:$0xff]  ;;  %v735_v29 = vld [vmem:[%s645_s25 + $0xe8] sm:$0xff] }
  0x29   : > { %v738_v30 = vld [vmem:[%s645_s25 + $0xf0] sm:$0xff]  ;;  %v741_v31 = vld [vmem:[%s645_s25 + $0xf8] sm:$0xff]  ;;  %v744_v32 = vld [vmem:[%s645_s25 + $0x100] sm:$0xff] }
  0x2a   : > { %v747_v33 = vld [vmem:[%s645_s25 + $0x108] sm:$0xff]  ;;  %v750_v34 = vld [vmem:[%s645_s25 + $0x110] sm:$0xff]  ;;  %v753_v35 = vld [vmem:[%s645_s25 + $0x118] sm:$0xff] }
  0x2b   : > { %v756_v36 = vld [vmem:[%s645_s25 + $0x120] sm:$0xff]  ;;  %v759_v37 = vld [vmem:[%s645_s25 + $0x128] sm:$0xff]  ;;  %v762_v38 = vld [vmem:[%s645_s25 + $0x130] sm:$0xff] }
  0x2c   : > { %v765_v39 = vld [vmem:[%s645_s25 + $0x138] sm:$0xff]  ;;  %v768_v40 = vld [vmem:[%s645_s25 + $0x140] sm:$0xff]  ;;  %v771_v41 = vld [vmem:[%s645_s25 + $0x148] sm:$0xff] }
  0x2d   : > { %v774_v42 = vld [vmem:[%s645_s25 + $0x150] sm:$0xff]  ;;  %v777_v43 = vld [vmem:[%s645_s25 + $0x158] sm:$0xff]  ;;  %v780_v44 = vld [vmem:[%s645_s25 + $0x160] sm:$0xff] }
  0x2e   : > { %v783_v45 = vld [vmem:[%s645_s25 + $0x168] sm:$0xff]  ;;  %v786_v46 = vld [vmem:[%s645_s25 + $0x170] sm:$0xff]  ;;  %v789_v47 = vld [vmem:[%s645_s25 + $0x178] sm:$0xff] }
  0x2f   : > { %v792_v48 = vld [vmem:[%s645_s25 + $0x180] sm:$0xff]  ;;  %v795_v49 = vld [vmem:[%s645_s25 + $0x188] sm:$0xff]  ;;  %v798_v50 = vld [vmem:[%s645_s25 + $0x190] sm:$0xff] }
  0x30   : > { %v801_v51 = vld [vmem:[%s645_s25 + $0x198] sm:$0xff]  ;;  %v804_v52 = vld [vmem:[%s645_s25 + $0x1a0] sm:$0xff]  ;;  %v807_v53 = vld [vmem:[%s645_s25 + $0x1a8] sm:$0xff] }
  0x31   : > { %v810_v54 = vld [vmem:[%s645_s25 + $0x1b0] sm:$0xff]  ;;  %v813_v55 = vld [vmem:[%s645_s25 + $0x1b8] sm:$0xff]  ;;  %v816_v56 = vld [vmem:[%s645_s25 + $0x1c0] sm:$0xff] }
  0x32   : > { %v819_v57 = vld [vmem:[%s645_s25 + $0x1c8] sm:$0xff]  ;;  %v822_v58 = vld [vmem:[%s645_s25 + $0x1d0] sm:$0xff]  ;;  %v825_v59 = vld [vmem:[%s645_s25 + $0x1d8] sm:$0xff] }
  0x33   : > { %v828_v60 = vld [vmem:[%s645_s25 + $0x1e0] sm:$0xff]  ;;  %v831_v61 = vld [vmem:[%s645_s25 + $0x1e8] sm:$0xff]  ;;  %v834_v62 = vld [vmem:[%s645_s25 + $0x1f0] sm:$0xff] }
  0x34   : > { %v837_v63 = vld [vmem:[%s645_s25 + $0x1f8] sm:$0xff] }
  0x35   : > { %257 = vsyncadd [#allocation3], 8192 }
  0x36   : > { %593 = dma.done.wait [#allocation3], 8192 }
  0x37   : > { %594 = vsyncadd [#allocation3], 4294959104  ;;  %326 = vst [vmem:[%s639_s21] sm:$0xff] %v648_v0 }
  0x38   : > { %327 = vst [vmem:[%s639_s21 + $0x8] sm:$0xff] %v651_v1  ;;  %328 = vst [vmem:[%s639_s21 + $0x10] sm:$0xff] %v654_v2 }
  0x39   : > { %329 = vst [vmem:[%s639_s21 + $0x18] sm:$0xff] %v657_v3  ;;  %330 = vst [vmem:[%s639_s21 + $0x20] sm:$0xff] %v660_v4 }
  0x3a   : > { %331 = vst [vmem:[%s639_s21 + $0x28] sm:$0xff] %v663_v5  ;;  %332 = vst [vmem:[%s639_s21 + $0x30] sm:$0xff] %v666_v6 }
  0x3b   : > { %333 = vst [vmem:[%s639_s21 + $0x38] sm:$0xff] %v669_v7  ;;  %334 = vst [vmem:[%s639_s21 + $0x40] sm:$0xff] %v672_v8 }
  0x3c   : > { %335 = vst [vmem:[%s639_s21 + $0x48] sm:$0xff] %v675_v9  ;;  %336 = vst [vmem:[%s639_s21 + $0x50] sm:$0xff] %v678_v10 }
  0x3d   : > { %337 = vst [vmem:[%s639_s21 + $0x58] sm:$0xff] %v681_v11  ;;  %338 = vst [vmem:[%s639_s21 + $0x60] sm:$0xff] %v684_v12 }
  0x3e   : > { %339 = vst [vmem:[%s639_s21 + $0x68] sm:$0xff] %v687_v13  ;;  %340 = vst [vmem:[%s639_s21 + $0x70] sm:$0xff] %v690_v14 }
  0x3f   : > { %341 = vst [vmem:[%s639_s21 + $0x78] sm:$0xff] %v693_v15  ;;  %342 = vst [vmem:[%s639_s21 + $0x80] sm:$0xff] %v696_v16 }
  0x40   : > { %343 = vst [vmem:[%s639_s21 + $0x88] sm:$0xff] %v699_v17  ;;  %344 = vst [vmem:[%s639_s21 + $0x90] sm:$0xff] %v702_v18 }
  0x41   : > { %345 = vst [vmem:[%s639_s21 + $0x98] sm:$0xff] %v705_v19  ;;  %346 = vst [vmem:[%s639_s21 + $0xa0] sm:$0xff] %v708_v20 }
  0x42   : > { %347 = vst [vmem:[%s639_s21 + $0xa8] sm:$0xff] %v711_v21  ;;  %348 = vst [vmem:[%s639_s21 + $0xb0] sm:$0xff] %v714_v22 }
  0x43   : > { %349 = vst [vmem:[%s639_s21 + $0xb8] sm:$0xff] %v717_v23  ;;  %350 = vst [vmem:[%s639_s21 + $0xc0] sm:$0xff] %v720_v24 }
  0x44   : > { %351 = vst [vmem:[%s639_s21 + $0xc8] sm:$0xff] %v723_v25  ;;  %352 = vst [vmem:[%s639_s21 + $0xd0] sm:$0xff] %v726_v26 }
  0x45   : > { %353 = vst [vmem:[%s639_s21 + $0xd8] sm:$0xff] %v729_v27  ;;  %354 = vst [vmem:[%s639_s21 + $0xe0] sm:$0xff] %v732_v28 }
  0x46   : > { %355 = vst [vmem:[%s639_s21 + $0xe8] sm:$0xff] %v735_v29  ;;  %356 = vst [vmem:[%s639_s21 + $0xf0] sm:$0xff] %v738_v30 }
  0x47   : > { %357 = vst [vmem:[%s639_s21 + $0xf8] sm:$0xff] %v741_v31  ;;  %358 = vst [vmem:[%s639_s21 + $0x100] sm:$0xff] %v744_v32 }
  0x48   : > { %359 = vst [vmem:[%s639_s21 + $0x108] sm:$0xff] %v747_v33  ;;  %360 = vst [vmem:[%s639_s21 + $0x110] sm:$0xff] %v750_v34 }
  0x49   : > { %361 = vst [vmem:[%s639_s21 + $0x118] sm:$0xff] %v753_v35  ;;  %362 = vst [vmem:[%s639_s21 + $0x120] sm:$0xff] %v756_v36 }
  0x4a   : > { %363 = vst [vmem:[%s639_s21 + $0x128] sm:$0xff] %v759_v37  ;;  %364 = vst [vmem:[%s639_s21 + $0x130] sm:$0xff] %v762_v38 }
  0x4b   : > { %365 = vst [vmem:[%s639_s21 + $0x138] sm:$0xff] %v765_v39  ;;  %366 = vst [vmem:[%s639_s21 + $0x140] sm:$0xff] %v768_v40 }
  0x4c   : > { %367 = vst [vmem:[%s639_s21 + $0x148] sm:$0xff] %v771_v41  ;;  %368 = vst [vmem:[%s639_s21 + $0x150] sm:$0xff] %v774_v42 }
  0x4d   : > { %369 = vst [vmem:[%s639_s21 + $0x158] sm:$0xff] %v777_v43  ;;  %370 = vst [vmem:[%s639_s21 + $0x160] sm:$0xff] %v780_v44 }
  0x4e   : > { %371 = vst [vmem:[%s639_s21 + $0x168] sm:$0xff] %v783_v45  ;;  %372 = vst [vmem:[%s639_s21 + $0x170] sm:$0xff] %v786_v46 }
  0x4f   : > { %373 = vst [vmem:[%s639_s21 + $0x178] sm:$0xff] %v789_v47  ;;  %374 = vst [vmem:[%s639_s21 + $0x180] sm:$0xff] %v792_v48 }
  0x50   : > { %375 = vst [vmem:[%s639_s21 + $0x188] sm:$0xff] %v795_v49  ;;  %376 = vst [vmem:[%s639_s21 + $0x190] sm:$0xff] %v798_v50 }
  0x51   : > { %377 = vst [vmem:[%s639_s21 + $0x198] sm:$0xff] %v801_v51  ;;  %378 = vst [vmem:[%s639_s21 + $0x1a0] sm:$0xff] %v804_v52 }
  0x52   : > { %379 = vst [vmem:[%s639_s21 + $0x1a8] sm:$0xff] %v807_v53  ;;  %380 = vst [vmem:[%s639_s21 + $0x1b0] sm:$0xff] %v810_v54 }
  0x53   : > { %381 = vst [vmem:[%s639_s21 + $0x1b8] sm:$0xff] %v813_v55  ;;  %382 = vst [vmem:[%s639_s21 + $0x1c0] sm:$0xff] %v816_v56 }
  0x54   : > { %383 = vst [vmem:[%s639_s21 + $0x1c8] sm:$0xff] %v819_v57  ;;  %384 = vst [vmem:[%s639_s21 + $0x1d0] sm:$0xff] %v822_v58 }
  0x55   : > { %385 = vst [vmem:[%s639_s21 + $0x1d8] sm:$0xff] %v825_v59  ;;  %386 = vst [vmem:[%s639_s21 + $0x1e0] sm:$0xff] %v828_v60 }
  0x56   : > { %387 = vst [vmem:[%s639_s21 + $0x1e8] sm:$0xff] %v831_v61  ;;  %388 = vst [vmem:[%s639_s21 + $0x1f0] sm:$0xff] %v834_v62 }
  0x57   : > { %389 = vst [vmem:[%s639_s21 + $0x1f8] sm:$0xff] %v837_v63 }
  0x58 PF: > { %p547_p9 = scmp.ne.s32.totalorder %s634_s16, 0 }
  0x5a   : > { %393 = sbr.rel (%p547_p9) target bundleno = 128 (0x80), region = 54 }
  0x5f   : > { %v604_v0 = vmov 0.0  }
  0x60   : > { %394 = vst [vmem:[%s639_s21] sm:$0xff] %v604_v0  ;;  %395 = vst [vmem:[%s639_s21 + $0x8] sm:$0xff] %v604_v0 }
  0x61   : > { %396 = vst [vmem:[%s639_s21 + $0x10] sm:$0xff] %v604_v0  ;;  %397 = vst [vmem:[%s639_s21 + $0x18] sm:$0xff] %v604_v0 }
  0x62   : > { %398 = vst [vmem:[%s639_s21 + $0x20] sm:$0xff] %v604_v0  ;;  %399 = vst [vmem:[%s639_s21 + $0x28] sm:$0xff] %v604_v0 }
  0x63   : > { %400 = vst [vmem:[%s639_s21 + $0x30] sm:$0xff] %v604_v0  ;;  %401 = vst [vmem:[%s639_s21 + $0x38] sm:$0xff] %v604_v0 }
  0x64   : > { %402 = vst [vmem:[%s639_s21 + $0x40] sm:$0xff] %v604_v0  ;;  %403 = vst [vmem:[%s639_s21 + $0x48] sm:$0xff] %v604_v0 }
  0x65   : > { %404 = vst [vmem:[%s639_s21 + $0x50] sm:$0xff] %v604_v0  ;;  %405 = vst [vmem:[%s639_s21 + $0x58] sm:$0xff] %v604_v0 }
  0x66   : > { %406 = vst [vmem:[%s639_s21 + $0x60] sm:$0xff] %v604_v0  ;;  %407 = vst [vmem:[%s639_s21 + $0x68] sm:$0xff] %v604_v0 }
  0x67   : > { %408 = vst [vmem:[%s639_s21 + $0x70] sm:$0xff] %v604_v0  ;;  %409 = vst [vmem:[%s639_s21 + $0x78] sm:$0xff] %v604_v0 }
  0x68   : > { %410 = vst [vmem:[%s639_s21 + $0x80] sm:$0xff] %v604_v0  ;;  %411 = vst [vmem:[%s639_s21 + $0x88] sm:$0xff] %v604_v0 }
  0x69   : > { %412 = vst [vmem:[%s639_s21 + $0x90] sm:$0xff] %v604_v0  ;;  %413 = vst [vmem:[%s639_s21 + $0x98] sm:$0xff] %v604_v0 }
  0x6a   : > { %414 = vst [vmem:[%s639_s21 + $0xa0] sm:$0xff] %v604_v0  ;;  %415 = vst [vmem:[%s639_s21 + $0xa8] sm:$0xff] %v604_v0 }
  0x6b   : > { %416 = vst [vmem:[%s639_s21 + $0xb0] sm:$0xff] %v604_v0  ;;  %417 = vst [vmem:[%s639_s21 + $0xb8] sm:$0xff] %v604_v0 }
  0x6c   : > { %418 = vst [vmem:[%s639_s21 + $0xc0] sm:$0xff] %v604_v0  ;;  %419 = vst [vmem:[%s639_s21 + $0xc8] sm:$0xff] %v604_v0 }
  0x6d   : > { %420 = vst [vmem:[%s639_s21 + $0xd0] sm:$0xff] %v604_v0  ;;  %421 = vst [vmem:[%s639_s21 + $0xd8] sm:$0xff] %v604_v0 }
  0x6e   : > { %422 = vst [vmem:[%s639_s21 + $0xe0] sm:$0xff] %v604_v0  ;;  %423 = vst [vmem:[%s639_s21 + $0xe8] sm:$0xff] %v604_v0 }
  0x6f   : > { %424 = vst [vmem:[%s639_s21 + $0xf0] sm:$0xff] %v604_v0  ;;  %425 = vst [vmem:[%s639_s21 + $0xf8] sm:$0xff] %v604_v0 }
  0x70   : > { %426 = vst [vmem:[%s639_s21 + $0x100] sm:$0xff] %v604_v0  ;;  %427 = vst [vmem:[%s639_s21 + $0x108] sm:$0xff] %v604_v0 }
  0x71   : > { %428 = vst [vmem:[%s639_s21 + $0x110] sm:$0xff] %v604_v0  ;;  %429 = vst [vmem:[%s639_s21 + $0x118] sm:$0xff] %v604_v0 }
  0x72   : > { %430 = vst [vmem:[%s639_s21 + $0x120] sm:$0xff] %v604_v0  ;;  %431 = vst [vmem:[%s639_s21 + $0x128] sm:$0xff] %v604_v0 }
  0x73   : > { %432 = vst [vmem:[%s639_s21 + $0x130] sm:$0xff] %v604_v0  ;;  %433 = vst [vmem:[%s639_s21 + $0x138] sm:$0xff] %v604_v0 }
  0x74   : > { %434 = vst [vmem:[%s639_s21 + $0x140] sm:$0xff] %v604_v0  ;;  %435 = vst [vmem:[%s639_s21 + $0x148] sm:$0xff] %v604_v0 }
  0x75   : > { %436 = vst [vmem:[%s639_s21 + $0x150] sm:$0xff] %v604_v0  ;;  %437 = vst [vmem:[%s639_s21 + $0x158] sm:$0xff] %v604_v0 }
  0x76   : > { %438 = vst [vmem:[%s639_s21 + $0x160] sm:$0xff] %v604_v0  ;;  %439 = vst [vmem:[%s639_s21 + $0x168] sm:$0xff] %v604_v0 }
  0x77   : > { %440 = vst [vmem:[%s639_s21 + $0x170] sm:$0xff] %v604_v0  ;;  %441 = vst [vmem:[%s639_s21 + $0x178] sm:$0xff] %v604_v0 }
  0x78   : > { %442 = vst [vmem:[%s639_s21 + $0x180] sm:$0xff] %v604_v0  ;;  %443 = vst [vmem:[%s639_s21 + $0x188] sm:$0xff] %v604_v0 }
  0x79   : > { %444 = vst [vmem:[%s639_s21 + $0x190] sm:$0xff] %v604_v0  ;;  %445 = vst [vmem:[%s639_s21 + $0x198] sm:$0xff] %v604_v0 }
  0x7a   : > { %446 = vst [vmem:[%s639_s21 + $0x1a0] sm:$0xff] %v604_v0  ;;  %447 = vst [vmem:[%s639_s21 + $0x1a8] sm:$0xff] %v604_v0 }
  0x7b   : > { %448 = vst [vmem:[%s639_s21 + $0x1b0] sm:$0xff] %v604_v0  ;;  %449 = vst [vmem:[%s639_s21 + $0x1b8] sm:$0xff] %v604_v0 }
  0x7c   : > { %450 = vst [vmem:[%s639_s21 + $0x1c0] sm:$0xff] %v604_v0  ;;  %451 = vst [vmem:[%s639_s21 + $0x1c8] sm:$0xff] %v604_v0 }
  0x7d   : > { %452 = vst [vmem:[%s639_s21 + $0x1d0] sm:$0xff] %v604_v0  ;;  %453 = vst [vmem:[%s639_s21 + $0x1d8] sm:$0xff] %v604_v0 }
  0x7e   : > { %454 = vst [vmem:[%s639_s21 + $0x1e0] sm:$0xff] %v604_v0  ;;  %455 = vst [vmem:[%s639_s21 + $0x1e8] sm:$0xff] %v604_v0 }
  0x7f   : > { %456 = vst [vmem:[%s639_s21 + $0x1f0] sm:$0xff] %v604_v0  ;;  %457 = vst [vmem:[%s639_s21 + $0x1f8] sm:$0xff] %v604_v0 }
  0x80 PF: > { %s18_s15 = sadd.s32 1, %s601_s15   ;;  %s1105_s14 = smov %s1107_s0 }
  0x81   : > { %p15_p10 = scmp.ge.s32.totalorder %s18_s15, 9  }
  0x83   :  { %17 = sbr.rel (!%p15_p10) target bundleno = 16 (0x10), region = 90 }
  0x88   :  { %487 = vsyncmov [#allocation3] }
  0x8b   :  { %s488_s26 = vpop.sfrf %487 }
  0x8c   :  { %p550_p11 = scmp.ne.s32.totalorder %s488_s26, 0 }
  0x8e   :  { %492 = shalt.err (%p550_p11)  }

</bundles_post_ra>
